<compile_context>
chip_gen: v7x
topology: tpu7x:2x2x1
jax: 0.10.0
libtpu: 0.0.40
codegen_flags: <defaults>
</compile_context>

<pallas_src>
import functools

import numpy as np
import jax
import jax.numpy as jnp
from jax import lax
from jax.experimental import pallas as pl
from jax.experimental.pallas import tpu as pltpu


# ----------------------------- kernels --------------------------------------


def _upconv_concat_kernel(g_ref, w_ref, b_ref, s_ref, o_ref, *,
                          n_batch, l_tile, c_out, apply_relu):
    # g_ref: (1, C_in*K, N*TL)   w_ref: (C_out, C_in*K)   b_ref: (C_out, 1)
    # s_ref: (N, C_s, TL)        o_ref: (N, C_out + C_s, TL)
    y = jnp.dot(w_ref[...], g_ref[0], preferred_element_type=jnp.float32)
    y = y + b_ref[...]
    if apply_relu:
        y = jnp.maximum(y, 0.0)
    y = y.astype(o_ref.dtype)                       # (C_out, N*TL)
    # Fused channel-concat: skip slab written once, conv slab per batch.
    o_ref[:, c_out:, :] = s_ref[...]
    for n in range(n_batch):                        # static unroll, no grid cost
        o_ref[n, :c_out, :] = y[:, n * l_tile:(n + 1) * l_tile]


def _upconv_kernel(g_ref, w_ref, b_ref, o_ref, *, n_batch, l_tile, apply_relu):
    # Same as above but without the skip tensor (last=True path).
    y = jnp.dot(w_ref[...], g_ref[0], preferred_element_type=jnp.float32)
    y = y + b_ref[...]
    if apply_relu:
        y = jnp.maximum(y, 0.0)
    y = y.astype(o_ref.dtype)
    for n in range(n_batch):
        o_ref[n] = y[:, n * l_tile:(n + 1) * l_tile]


# ------------------------------ glue -----------------------------------------


def _pick_l_tile(l_out, bytes_per_len, vmem_budget=8 << 20):
    """Largest length tile (multiple of 128 when tiling) that divides L_out and
    keeps the double-buffered per-step working set under `vmem_budget`."""
    if l_out * bytes_per_len * 2 <= vmem_budget:
        return l_out
    if l_out % 128 != 0:
        return l_out                       # can't tile cleanly; single block
    cap = max((vmem_budget // (2 * bytes_per_len)) // 128 * 128, 128)
    t = min(cap, l_out)
    while t >= 128:
        if l_out % t == 0:
            return t
        t -= 128
    return l_out


def _build_im2col_t(x, K, stride, padding, L_out, TL):
    """Transposed, tile-major im2col for ConvTranspose1d.

    Returns G of shape (num_lt, C_in*K, N*TL) with
      G[lt, ci*K + k, n*TL + j] = x[n, ci, (lo + padding - k)//stride] * valid,
      lo = lt*TL + j.
    Single static-index gather (invalid taps routed to a padded zero column);
    the trailing transpose only permutes leading axes (lane dim stays put).
    """
    N, C_in, L_in = x.shape
    num_lt = L_out // TL
    lo = np.arange(L_out)[None, :]                       # (1, L_out)
    k = np.arange(K)[:, None]                            # (K, 1)
    t = lo + padding - k                                 # (K, L_out)
    valid = (t % stride == 0) & (t >= 0) & (t < stride * L_in)
    li = np.where(valid, t // stride, L_in)              # invalid -> zero column
    x_pad = jnp.concatenate([x, jnp.zeros((N, C_in, 1), x.dtype)], axis=-1)
    g = x_pad[:, :, li]                                  # (N, C_in, K, L_out)
    g = g.reshape(N, C_in, K, num_lt, TL)
    g = g.transpose(3, 1, 2, 0, 4)                       # (num_lt, C_in, K, N, TL)
    return g.reshape(num_lt, C_in * K, N * TL)


# ----------------------------- forward ---------------------------------------


def upconv_block1d_forward(params, x, s=None, *, stride, padding, last=False):
    """Forward of UpConvBlock1d.

    x: (N, ip_sz, L_in); s: (N, C_s, L_out) skip (required unless last=True).
    Returns (N, op_sz + C_s, L_out) if not last, else (N, op_sz, L_out).
    """
    weight, bias = params["weight"], params["bias"]
    N, C_in, L_in = x.shape
    _, C_out, K = weight.shape
    L_out = (L_in - 1) * stride - 2 * padding + K
    CK = C_in * K

    if last:
        bytes_per_len = 4 * N * (CK + C_out)
    else:
        C_s = s.shape[1]
        bytes_per_len = 4 * N * (CK + C_out + 2 * C_s)

    TL = _pick_l_tile(L_out, bytes_per_len)
    num_lt = L_out // TL

    g = _build_im2col_t(x, K, stride, padding, L_out, TL)      # (num_lt, CK, N*TL)
    w_t = weight.transpose(1, 0, 2).reshape(C_out, CK)         # [co, ci*K + k]
    b_col = bias.reshape(C_out, 1)

    compiler_params = pltpu.CompilerParams(
        dimension_semantics=("parallel",))   # disjoint L tiles -> megacore-safe

    if last:
        kern = functools.partial(_upconv_kernel, n_batch=N, l_tile=TL,
                                 apply_relu=False)
        return pl.pallas_call(
            kern,
            out_shape=jax.ShapeDtypeStruct((N, C_out, L_out), x.dtype),
            grid=(num_lt,),
            in_specs=[
                pl.BlockSpec((1, CK, N * TL), lambda lt: (lt, 0, 0)),
                pl.BlockSpec((C_out, CK), lambda lt: (0, 0)),
                pl.BlockSpec((C_out, 1), lambda lt: (0, 0)),
            ],
            out_specs=pl.BlockSpec((N, C_out, TL), lambda lt: (0, 0, lt)),
            compiler_params=compiler_params,
        )(g, w_t, b_col)

    kern = functools.partial(_upconv_concat_kernel, n_batch=N, l_tile=TL,
                             c_out=C_out, apply_relu=True)
    return pl.pallas_call(
        kern,
        out_shape=jax.ShapeDtypeStruct((N, C_out + C_s, L_out), x.dtype),
        grid=(num_lt,),
        in_specs=[
            pl.BlockSpec((1, CK, N * TL), lambda lt: (lt, 0, 0)),
            pl.BlockSpec((C_out, CK), lambda lt: (0, 0)),
            pl.BlockSpec((C_out, 1), lambda lt: (0, 0)),
            pl.BlockSpec((N, C_s, TL), lambda lt: (0, 0, lt)),
        ],
        out_specs=pl.BlockSpec((N, C_out + C_s, TL), lambda lt: (0, 0, lt)),
        compiler_params=compiler_params,
    )(g, w_t, b_col, s)


# --------------------------- pure-JAX reference -------------------------------


def conv_transpose1d_ref(x, weight, bias, *, stride, padding):
    """Pure-JAX reference (lax.conv_general_dilated) for correctness check."""
    K = weight.shape[-1]
    rhs = jnp.flip(weight, axis=-1).transpose(1, 0, 2)  # (C_out, C_in, K)
    y = lax.conv_general_dilated(
        x, rhs, window_strides=(1,),
        padding=[(K - 1 - padding, K - 1 - padding)],
        lhs_dilation=(stride,),
        dimension_numbers=("NCH", "OIH", "NCH"))
    return y + bias[None, :, None]


# --------------------------------- main ---------------------------------------


if __name__ == "__main__":
    # Module hyperparameters (small shapes).
    ip_sz, op_sz = 8, 8
    kernel_size, stride, padding = 4, 2, 1

    N, L_in = 2, 16
    L_out = (L_in - 1) * stride - 2 * padding + kernel_size  # 32

    key = jax.random.PRNGKey(0)
    kw, kb, kx, ks = jax.random.split(key, 4)
    params = {
        # nn.ConvTranspose1d weight shape: (in_channels, out_channels, K)
        "weight": jax.random.normal(kw, (ip_sz, op_sz, kernel_size), jnp.float32) * 0.1,
        "bias": jax.random.normal(kb, (op_sz,), jnp.float32) * 0.1,
    }
    x = jax.random.normal(kx, (N, ip_sz, L_in), jnp.float32)
    s = jax.random.normal(ks, (N, op_sz, L_out), jnp.float32)  # skip connection

    # not-last path: conv -> relu -> concat(skip) fused in the kernel.
    out = upconv_block1d_forward(params, x, s, stride=stride, padding=padding,
                                 last=False)
    out = jax.block_until_ready(out)
    assert out.shape == (N, op_sz + s.shape[1], L_out), out.shape

    y_ref = conv_transpose1d_ref(x, params["weight"], params["bias"],
                                 stride=stride, padding=padding)
    expected = jnp.concatenate((jnp.maximum(y_ref, 0.0), s), axis=-2)
    assert jnp.allclose(out, expected, rtol=1e-4, atol=1e-4), \
        "mismatch vs reference (not-last path)"

    # last path: plain transposed conv (no relu, no concat).
    out_last = upconv_block1d_forward(params, x, None, stride=stride,
                                      padding=padding, last=True)
    out_last = jax.block_until_ready(out_last)
    assert out_last.shape == (N, op_sz, L_out), out_last.shape
    assert jnp.allclose(out_last, y_ref, rtol=1e-4, atol=1e-4), \
        "mismatch vs reference (last path)"

    print("KERNEL_OK")
</pallas_src>

<mosaic_0001>
module attributes {stable_mosaic.version = 11 : i64} {
  func.func @_upconv_concat_kernel(%arg0: i32, %arg1: memref<1x32x64xf32, #tpu.memory_space<vmem>>, %arg2: memref<8x32xf32, #tpu.memory_space<vmem>>, %arg3: memref<8x1xf32, #tpu.memory_space<vmem>>, %arg4: memref<2x8x32xf32, #tpu.memory_space<vmem>>, %arg5: memref<2x16x32xf32, #tpu.memory_space<vmem>>) attributes {dimension_semantics = [#tpu.dimension_semantics<parallel>], iteration_bounds = array<i64: 1>, scalar_prefetch = 0 : i64, scratch_operands = 0 : i64, tpu.core_type = #tpu.core_type<tc>, window_params = [{transform_indices = @transform_0, window_bounds = array<i64: 1, 32, 64>}, {pipeline_mode = #tpu.pipeline_mode<synchronous>, transform_indices = @transform_1, window_bounds = array<i64: 8, 32>}, {pipeline_mode = #tpu.pipeline_mode<synchronous>, transform_indices = @transform_2, window_bounds = array<i64: 8, 1>}, {transform_indices = @transform_3, window_bounds = array<i64: 2, 8, 32>}, {transform_indices = @transform_4, window_bounds = array<i64: 2, 16, 32>}]} {
    %c0 = arith.constant 0 : index
    %c0_0 = arith.constant 0 : index
    %0 = vector.load %arg2[%c0, %c0_0] : memref<8x32xf32, #tpu.memory_space<vmem>>, vector<8x32xf32>
    %c0_1 = arith.constant 0 : index
    %c0_2 = arith.constant 0 : index
    %c0_3 = arith.constant 0 : index
    %1 = vector.load %arg1[%c0_1, %c0_2, %c0_3] : memref<1x32x64xf32, #tpu.memory_space<vmem>>, vector<1x32x64xf32>
    %2 = vector.shape_cast %1 : vector<1x32x64xf32> to vector<32x64xf32>
    %cst = arith.constant dense<0.000000e+00> : vector<8x64xf32>
    %3 = tpu.matmul %0, %2, %cst {dimension_numbers = #tpu.dot_dimension_numbers<[1], [0], [0], [1], [0, 0, 1, 1], [], []>} : vector<8x32xf32>, vector<32x64xf32>, vector<8x64xf32> -> vector<8x64xf32>
    %c0_4 = arith.constant 0 : index
    %c0_5 = arith.constant 0 : index
    %4 = vector.load %arg3[%c0_4, %c0_5] : memref<8x1xf32, #tpu.memory_space<vmem>>, vector<8x1xf32>
    %5 = vector.broadcast %4 : vector<8x1xf32> to vector<8x64xf32>
    %6 = arith.addf %3, %5 : vector<8x64xf32>
    %cst_6 = arith.constant 0.000000e+00 : f32
    %7 = vector.broadcast %cst_6 : f32 to vector<8x64xf32>
    %8 = arith.maximumf %6, %7 : vector<8x64xf32>
    %c0_7 = arith.constant 0 : index
    %c0_8 = arith.constant 0 : index
    %c0_9 = arith.constant 0 : index
    %9 = vector.load %arg4[%c0_7, %c0_8, %c0_9] : memref<2x8x32xf32, #tpu.memory_space<vmem>>, vector<2x8x32xf32>
    %c0_10 = arith.constant 0 : index
    %c8 = arith.constant 8 : index
    %c0_11 = arith.constant 0 : index
    %10 = vector.load %arg5[%c0_10, %c8, %c0_11] : memref<2x16x32xf32, #tpu.memory_space<vmem>>, vector<2x8x32xf32>
    tpu.vector_store %arg5[%c0_10, %c8, %c0_11], %9 {strides = array<i32>} : memref<2x16x32xf32, #tpu.memory_space<vmem>>, vector<2x8x32xf32>,
    %11 = vector.extract_strided_slice %8 {offsets = [0, 0], sizes = [8, 32], strides = [1, 1]} : vector<8x64xf32> to vector<8x32xf32>
    %c0_12 = arith.constant 0 : index
    %c0_13 = arith.constant 0 : index
    %c0_14 = arith.constant 0 : index
    %12 = vector.load %arg5[%c0_12, %c0_13, %c0_14] : memref<2x16x32xf32, #tpu.memory_space<vmem>>, vector<1x8x32xf32>
    %13 = vector.shape_cast %12 : vector<1x8x32xf32> to vector<8x32xf32>
    %14 = vector.shape_cast %11 : vector<8x32xf32> to vector<1x8x32xf32>
    tpu.vector_store %arg5[%c0_12, %c0_13, %c0_14], %14 {strides = array<i32>} : memref<2x16x32xf32, #tpu.memory_space<vmem>>, vector<1x8x32xf32>,
    %15 = vector.extract_strided_slice %8 {offsets = [0, 32], sizes = [8, 32], strides = [1, 1]} : vector<8x64xf32> to vector<8x32xf32>
    %c1 = arith.constant 1 : index
    %c0_15 = arith.constant 0 : index
    %c0_16 = arith.constant 0 : index
    %16 = vector.load %arg5[%c1, %c0_15, %c0_16] : memref<2x16x32xf32, #tpu.memory_space<vmem>>, vector<1x8x32xf32>
    %17 = vector.shape_cast %16 : vector<1x8x32xf32> to vector<8x32xf32>
    %18 = vector.shape_cast %15 : vector<8x32xf32> to vector<1x8x32xf32>
    tpu.vector_store %arg5[%c1, %c0_15, %c0_16], %18 {strides = array<i32>} : memref<2x16x32xf32, #tpu.memory_space<vmem>>, vector<1x8x32xf32>,
    return
  }
  func.func @transform_0(%arg0: i32) -> (i32, i32, i32) {
    %c0_i32 = arith.constant 0 : i32
    %c0_i32_0 = arith.constant 0 : i32
    %c0_i32_1 = arith.constant 0 : i32
    return %arg0, %c0_i32, %c0_i32_0 : i32, i32, i32
  }
  func.func @transform_1(%arg0: i32) -> (i32, i32) {
    %c0_i32 = arith.constant 0 : i32
    %c0_i32_0 = arith.constant 0 : i32
    %c0_i32_1 = arith.constant 0 : i32
    return %c0_i32, %c0_i32_0 : i32, i32
  }
  func.func @transform_2(%arg0: i32) -> (i32, i32) {
    %c0_i32 = arith.constant 0 : i32
    %c0_i32_0 = arith.constant 0 : i32
    %c0_i32_1 = arith.constant 0 : i32
    return %c0_i32, %c0_i32_0 : i32, i32
  }
  func.func @transform_3(%arg0: i32) -> (i32, i32, i32) {
    %c0_i32 = arith.constant 0 : i32
    %c0_i32_0 = arith.constant 0 : i32
    %c0_i32_1 = arith.constant 0 : i32
    return %c0_i32, %c0_i32_0, %arg0 : i32, i32, i32
  }
  func.func @transform_4(%arg0: i32) -> (i32, i32, i32) {
    %c0_i32 = arith.constant 0 : i32
    %c0_i32_0 = arith.constant 0 : i32
    %c0_i32_1 = arith.constant 0 : i32
    return %c0_i32, %c0_i32_0, %arg0 : i32, i32, i32
  }
}

</mosaic_0001>

<bundles_post_ra>
// kernel: tpu_custom_call.1
= control target key start
LH: loop header
LB: loop body
LE: loop exit
PB: predicated region body
PF: predicated region fallthrough
CT: control target
= control target key end

     0   :  { %9 = vsyncpa [#allocation3], 0  ;;  %s356_s0 = inlined_call_operand.hbm [shape: f32[1,32,64], index: 0, kind: input, shape index: {}]   ;;  %s357_s1 = inlined_call_operand.hbm [shape: f32[8,32], index: 1, kind: input, shape index: {}]   ;;  %s358_s2 = inlined_call_operand.vmem [shape: f32[8,1], index: 2, kind: input, shape index: {}]   ;;  %s359_s3 = inlined_call_operand.vmem [shape: f32[2,8,32], index: 3, kind: input, shape index: {}]   ;;  %s360_s4 = inlined_call_operand.hbm [shape: f32[2,16,32], index: 4, kind: output, shape index: {}]  }
   0x1   :  { %10 = vsyncpa [#allocation6], 0 }
   0x2   :  { %11 = vsyncpa [#allocation4], 0  ;;  %s265_s15 = smov [#allocation2]   ;;  %s193_s19 = scalar_lea.hbm %s356_s0, 512 }
   0x3   :  { %s17_s16 = sshll.u32 %s265_s15, 4  ;;  %p194_p0 = scmp.ne.s32.totalorder %s356_s0, %s193_s19  ;;  %s18_s16 = int_to_ptr.vmem [resolvable:$true] %s17_s16 }
   0x4   :  { %p197_p1 = scmp.lt.u32.totalorder %s193_s19, %s356_s0 }
   0x6   :  { %p199_p2 = pnand %p197_p1, %p194_p0 }
   0x8   :  { %202 = shalt.err (!%p199_p2)
}
   0x9   :  { %s203_s24 = scalar_lea.vmem %s18_s16, 512  ;;  %p208_p4 = scmp.lt.s32.totalorder %s18_s16, %s18_s16 }
   0xa   :  { %p204_p3 = scmp.ne.s32.totalorder %s18_s16, %s203_s24  ;;  %p209_p5 = scmp.lt.s32.totalorder %s203_s24, %s203_s24 }
   0xc   :  { %p210_p6 = por %p209_p5, %p208_p4 }
   0xe   :  { %p211_p7 = pnand %p210_p6, %p204_p3 }
  0x10   :  { %214 = shalt.err (!%p211_p7)
}
  0x11   :  { %s266_s25 = smov 128   ;;  %s267_s26 = smov 8  }
  0x12   :  { %23 = dma.hbm_to_vmem [thread:$0]  %s356_s0, 512, %s18_s16, [#allocation3], %s266_s25, %s266_s25, %s267_s26  }
  0x13   :  { %s268_s29 = smov [#allocation5]   ;;  %s215_s7 = scalar_lea.hbm %s357_s1, 128 }
  0x14   :  { %s30_s30 = sshll.u32 %s268_s29, 4  ;;  %p216_p8 = scmp.ne.s32.totalorder %s357_s1, %s215_s7  ;;  %s31_s30 = int_to_ptr.vmem [resolvable:$true] %s30_s30 }
  0x15   :  { %p219_p9 = scmp.lt.u32.totalorder %s215_s7, %s357_s1 }
  0x17   :  { %p221_p10 = pnand %p219_p9, %p216_p8 }
  0x19   :  { %224 = shalt.err (!%p221_p10)
}
  0x1a   :  { %s225_s12 = scalar_lea.vmem %s31_s30, 128  ;;  %p230_p12 = scmp.lt.s32.totalorder %s31_s30, %s31_s30 }
  0x1b   :  { %p226_p11 = scmp.ne.s32.totalorder %s31_s30, %s225_s12  ;;  %p231_p13 = scmp.lt.s32.totalorder %s225_s12, %s225_s12 }
  0x1d   :  { %p232_p0 = por %p231_p13, %p230_p12 }
  0x1f   :  { %p233_p1 = pnand %p232_p0, %p226_p11 }
  0x21   :  { %236 = shalt.err (!%p233_p1)
}
  0x22   :  { %33 = dma.hbm_to_vmem [thread:$0]  %s357_s1, 128, %s31_s30, [#allocation6]  }
  0x23   :  { %259 = dma.done.wait [#allocation3], 512  }
  0x24   :  { %260 = vsyncadd [#allocation3], 4294966784 }
  0x25   :  { %261 = dma.done.wait [#allocation6], 128  }
  0x26   :  { %262 = vsyncadd [#allocation6], 4294967168  ;;  %v269_v0 = vmov 0.0|0.0   ;;  %vm270_vm0 = vmmov 0   ;;  %v271_v1 = vmov 0.0   ;;  %v272_v2 = vmov 0  }
  0x27   :  { %176 = vmatprep.subr.bf16.mxu0 %v269_v0  ;;  %173 = vmatprep.mubr.msk.f32.mxu0 %vm270_vm0, %v271_v1  ;;  %v45_v3 = vld [vmem:[#allocation2] sm:$0xff]  ;;  %v46_v4 = vld [vmem:[#allocation2 + $0x8] sm:$0xff]  ;;  %v47_v5 = vld [vmem:[#allocation2 + $0x10] sm:$0xff]  ;;  %vm55_vm1 = vcmask 261120   ;;  %s274_s19 = smov [#allocation7]  }
  0x28   :  { %192 = vset.pattern.permute.xlu0 %v272_v2  ;;  %v177_v6 = vpack.c.bf16 %v46_v4, %v45_v3  ;;  %v48_v7 = vld [vmem:[#allocation2 + $0x18] sm:$0xff]  ;;  %v49_v8 = vld [vmem:[%s358_s2] sm:$0xff]  ;;  %v131_v12 = vld [vmem:[%s359_s3 + $0x8] sm:$0xff]  ;;  %s273_s2 = smov 96   ;;  %s146_s20 = sshll.u32 %s274_s19, 4  ;;  %s147_s20 = int_to_ptr.vmem [resolvable:$true] %s146_s20 }
  0x29   :  { %52 = vperm.xlu0 %192, %v49_v8   ;;  %v180_v9 = vpack.c.bf16 %v48_v7, %v47_v5  ;;  %v44_v10 = vld [vmem:[#allocation5] sm:$0xff]  ;;  %133 = vst.msk [vmem:[#allocation7 + $0x18] sm:$0xff] %vm55_vm1, %v131_v12  ;;  %p242_p3 = scmp.lt.s32.totalorder %s147_s20, %s147_s20 }
  0x2a   :  { %178 = vmatpush3.bf16.msra.mxu0 %v177_v6  ;;  %v130_v11 = vld [vmem:[%s359_s3] sm:$0xff]  ;;  %s237_s3 = scalar_lea.vmem %s147_s20, 512 }
  0x2b   :  { %179 = vmatprep.subr.bf16.mxu0 %v269_v0  ;;  %132 = vst.msk [vmem:[#allocation7 + $0x8] sm:$0xff] %vm55_vm1, %v130_v11  ;;  %p238_p2 = scmp.ne.s32.totalorder %s147_s20, %s237_s3  ;;  %p243_p4 = scmp.lt.s32.totalorder %s237_s3, %s237_s3 }
  0x2d   :  { %p244_p5 = por %p243_p4, %p242_p3 }
  0x2e   :  { %181 = vmatpush3.bf16.msra.mxu0 %v180_v9 }
  0x2f   :  { %p245_p6 = pnand %p244_p5, %p238_p2 }
  0x31   :  { %174 = vmatmul.mubr.msk.f32.vlgmr.msra.gmra.mrb[0].mxu0 %vm55_vm1, %v44_v10 }
  0xa8   :  { %v53_v13 = vpop.permute.xlu0 %52 }
 0x104   :  { %v125_v14 = vpop.f32.mrb[0].mxu0 }
 0x105   :  { %v126_v15 = vadd.f32 %v125_v14, %v53_v13  ;;  %v175_v16 = vpop.f32.mrb[1].mxu0 }
 0x107   :  { %v129_v17 = vmax.f32 %v126_v15, 0.0 }
 0x109   :  { %134 = vst.msk [vmem:[#allocation7] sm:$0xff] %vm55_vm1, %v129_v17  ;;  %136 = vrot.lane.b32.xlu0 %v129_v17, %s273_s2 }
 0x17b   :  { %v137_v18 = vpop.permute.xlu0 %136 }
 0x17c   :  { %140 = vst.msk [vmem:[#allocation7 + $0x10] sm:$0xff] %vm55_vm1, %v137_v18 }
 0x17d   :  { %248 = shalt.err (!%p245_p6)
}
 0x17e   :  { %s249_s23 = scalar_lea.hbm %s360_s4, 512 }
 0x17f   :  { %p250_p7 = scmp.ne.s32.totalorder %s360_s4, %s249_s23  ;;  %p253_p8 = scmp.lt.u32.totalorder %s249_s23, %s360_s4 }
 0x181   :  { %p255_p9 = pnand %p253_p8, %p250_p7 }
 0x183   :  { %258 = shalt.err (!%p255_p9)
}
 0x184   :  { %152 = dma.vmem_to_hbm [thread:$0]  %s147_s20, 512, %s360_s4, [#allocation4], %s266_s25, %s266_s25, %s267_s26  }
 0x185   :  { %263 = dma.done.wait [#allocation4], 512  }
 0x186   :  { %264 = vsyncadd [#allocation4], 4294966784 }
 0x187   :  { %156 = vsyncpa [#allocation3], 1 }
 0x188   :  { %157 = vsyncpa [#allocation6], 1 }
 0x189   :  { %158 = vsyncpa [#allocation4], 1 }

</bundles_post_ra>
